<compile_context>
chip_gen: v7x
topology: tpu7x:2x2x1
jax: 0.10.0
libtpu: 0.0.40
codegen_flags: <defaults>
</compile_context>

<pallas_src>
import jax
import jax.numpy as jnp
from jax import lax
from jax.experimental import pallas as pl
from jax.experimental.pallas import tpu as pltpu


def _attention_kernel(x_ref, w_ref, out_ref):
    """Whole problem in one invocation (no grid).

    x_ref  : (bs, n, d)  query, f32
    w_ref  : (d, d)      nn.Linear weight (out_features, in_features), f32
    out_ref: (bs, n, n)  softmax attention weights, f32
    """
    x = x_ref[...]                                   # (bs, n, d)
    w = w_ref[...]                                   # (d, d)

    bs, n, d = x.shape

    # query_proj = linear_in(query) = x @ W^T.
    # Collapse batch: single (bs*n, d) @ (d_out, d_in)^T MXU contraction
    # (contract last dims of both operands -> no explicit transpose needed).
    q2d = lax.dot_general(
        x.reshape(bs * n, d), w,
        dimension_numbers=(((1,), (1,)), ((), ())),
        preferred_element_type=jnp.float32,
    )                                                # (bs*n, d)
    q = q2d.reshape(bs, n, d)

    # scores[b, i, j] = <q_proj[b, i], x[b, j]>  (matmul with context = x^T),
    # expressed as a contraction over the last dims -> no XLU transpose.
    scores = jnp.einsum("bnd,bmd->bnm", q, x,
                        preferred_element_type=jnp.float32)   # (bs, n, n)

    # Numerically stable softmax over the last dim (exact f32 divide).
    m = jnp.max(scores, axis=-1, keepdims=True)
    e = jnp.exp(scores - m)
    denom = jnp.sum(e, axis=-1, keepdims=True)
    out_ref[...] = (e / denom).astype(out_ref.dtype)


@jax.jit
def attention_module(query, w_linear_in):
    """JAX/Pallas equivalent of AttentionModule(attention_type='general').forward.

    query       : (bs, n_agents, dim) float32
    w_linear_in : (dim, dim) float32 -- PyTorch nn.Linear weight (out, in)
    returns     : (bs, n_agents, n_agents) float32 attention weights
    """
    bs, n, _ = query.shape
    return pl.pallas_call(
        _attention_kernel,
        out_shape=jax.ShapeDtypeStruct((bs, n, n), jnp.float32),
        # No grid: single step, full arrays resident in VMEM, no pipeline
        # prologue/epilogue or double-buffering of inputs read exactly once.
        in_specs=[
            pl.BlockSpec(memory_space=pltpu.MemorySpace.VMEM),
            pl.BlockSpec(memory_space=pltpu.MemorySpace.VMEM),
        ],
        out_specs=pl.BlockSpec(memory_space=pltpu.MemorySpace.VMEM),
    )(query, w_linear_in)


def _reference(query, w_linear_in):
    """Pure-JAX reference matching the PyTorch forward (attention_type='general')."""
    q_proj = jnp.einsum("bnd,od->bno", query, w_linear_in)   # nn.Linear, no bias
    scores = jnp.einsum("bnd,bmd->bnm", q_proj, query)       # matmul(query, context)
    return jax.nn.softmax(scores, axis=-1)


if __name__ == "__main__":
    key = jax.random.PRNGKey(0)
    k_x, k_w = jax.random.split(key)

    bs, n_agents, dim = 2, 8, 32

    query = jax.random.normal(k_x, (bs, n_agents, dim), dtype=jnp.float32)
    # nn.Linear(dim, dim, bias=False) weight: uniform(-1/sqrt(dim), 1/sqrt(dim))
    bound = 1.0 / (dim ** 0.5)
    w_linear_in = jax.random.uniform(
        k_w, (dim, dim), dtype=jnp.float32, minval=-bound, maxval=bound
    )

    out = attention_module(query, w_linear_in)
    out = jax.block_until_ready(out)

    ref = _reference(query, w_linear_in)
    assert out.shape == (bs, n_agents, n_agents)
    assert jnp.allclose(out, ref, atol=1e-5, rtol=1e-5), "mismatch vs reference"
    # rows of softmax sum to 1
    assert jnp.allclose(jnp.sum(out, axis=-1), 1.0, atol=1e-5)

    print("KERNEL_OK")
</pallas_src>

<mosaic_0001>
module attributes {stable_mosaic.version = 11 : i64} {
  func.func @_attention_kernel(%arg0: memref<2x8x32xf32, #tpu.memory_space<vmem>>, %arg1: memref<32x32xf32, #tpu.memory_space<vmem>>, %arg2: memref<2x8x8xf32, #tpu.memory_space<vmem>>) attributes {dimension_semantics = [], scalar_prefetch = 0 : i64, scratch_operands = 0 : i64, tpu.core_type = #tpu.core_type<tc>} {
    %c0 = arith.constant 0 : index
    %c0_0 = arith.constant 0 : index
    %c0_1 = arith.constant 0 : index
    %0 = vector.load %arg0[%c0, %c0_0, %c0_1] : memref<2x8x32xf32, #tpu.memory_space<vmem>>, vector<2x8x32xf32>
    %c0_2 = arith.constant 0 : index
    %c0_3 = arith.constant 0 : index
    %1 = vector.load %arg1[%c0_2, %c0_3] : memref<32x32xf32, #tpu.memory_space<vmem>>, vector<32x32xf32>
    %2 = vector.shape_cast %0 : vector<2x8x32xf32> to vector<16x32xf32>
    %cst = arith.constant dense<0.000000e+00> : vector<16x32xf32>
    %3 = tpu.matmul %2, %1, %cst {dimension_numbers = #tpu.dot_dimension_numbers<[1], [1], [0], [0], [0, 0, 1, 0], [], []>} : vector<16x32xf32>, vector<32x32xf32>, vector<16x32xf32> -> vector<16x32xf32>
    %4 = vector.shape_cast %3 : vector<16x32xf32> to vector<2x8x32xf32>
    "tpu.trace_start"() <{level = 10 : i32, message = "bnd,bmd->bnm"}> : () -> ()
    %cst_4 = arith.constant dense<0.000000e+00> : vector<2x8x8xf32>
    %5 = tpu.matmul %4, %0, %cst_4 {dimension_numbers = #tpu.dot_dimension_numbers<[2], [2], [1], [1], [0, 0, 0, 1, 1, 1], [0], [0]>} : vector<2x8x32xf32>, vector<2x8x32xf32>, vector<2x8x8xf32> -> vector<2x8x8xf32>
    "tpu.trace_stop"() : () -> ()
    %cst_5 = arith.constant dense<0xFF800000> : vector<2x8xf32>
    %6 = vector.multi_reduction <maximumf>, %5, %cst_5 [2] : vector<2x8x8xf32> to vector<2x8xf32>
    %7 = vector.shape_cast %6 : vector<2x8xf32> to vector<2x8x1xf32>
    %8 = vector.broadcast %7 : vector<2x8x1xf32> to vector<2x8x8xf32>
    %9 = arith.subf %5, %8 : vector<2x8x8xf32>
    %10 = math.exp %9 : vector<2x8x8xf32>
    %cst_6 = arith.constant dense<0.000000e+00> : vector<2x8xf32>
    %11 = vector.multi_reduction <add>, %10, %cst_6 [2] : vector<2x8x8xf32> to vector<2x8xf32>
    %12 = vector.shape_cast %11 : vector<2x8xf32> to vector<2x8x1xf32>
    %13 = vector.broadcast %12 : vector<2x8x1xf32> to vector<2x8x8xf32>
    %14 = arith.divf %10, %13 : vector<2x8x8xf32>
    %c0_7 = arith.constant 0 : index
    %c0_8 = arith.constant 0 : index
    %c0_9 = arith.constant 0 : index
    %15 = vector.load %arg2[%c0_7, %c0_8, %c0_9] : memref<2x8x8xf32, #tpu.memory_space<vmem>>, vector<2x8x8xf32>
    tpu.vector_store %arg2[%c0_7, %c0_8, %c0_9], %14 {strides = array<i32>} : memref<2x8x8xf32, #tpu.memory_space<vmem>>, vector<2x8x8xf32>,
    return
  }
}

</mosaic_0001>

<bundles_post_ra>
// kernel: attention_module.1
= control target key start
LH: loop header
LB: loop body
LE: loop exit
PB: predicated region body
PF: predicated region fallthrough
CT: control target
= control target key end

     0   :  { %7 = vsyncpa [#allocation3], 0  ;;  %s550_s0 = inlined_call_operand.hbm [shape: f32[2,8,32], index: 0, kind: input, shape index: {}]   ;;  %s551_s1 = inlined_call_operand.hbm [shape: f32[32,32], index: 1, kind: input, shape index: {}]   ;;  %s552_s2 = inlined_call_operand.hbm [shape: f32[2,8,8], index: 2, kind: output, shape index: {}]  }
   0x1   :  { %8 = vsyncpa [#allocation6], 0 }
   0x2   :  { %9 = vsyncpa [#allocation4], 0  ;;  %s469_s9 = smov [#allocation2]   ;;  %s397_s13 = scalar_lea.hbm %s550_s0, 256 }
   0x3   :  { %s15_s10 = sshll.u32 %s469_s9, 4  ;;  %p398_p0 = scmp.ne.s32.totalorder %s550_s0, %s397_s13  ;;  %s16_s10 = int_to_ptr.vmem [resolvable:$true] %s15_s10 }
   0x4   :  { %p401_p1 = scmp.lt.u32.totalorder %s397_s13, %s550_s0 }
   0x6   :  { %p403_p2 = pnand %p401_p1, %p398_p0 }
   0x8   :  { %406 = shalt.err (!%p403_p2)
}
   0x9   :  { %s407_s18 = scalar_lea.vmem %s16_s10, 256  ;;  %p412_p4 = scmp.lt.s32.totalorder %s16_s10, %s16_s10 }
   0xa   :  { %p408_p3 = scmp.ne.s32.totalorder %s16_s10, %s407_s18  ;;  %p413_p5 = scmp.lt.s32.totalorder %s407_s18, %s407_s18 }
   0xc   :  { %p414_p6 = por %p413_p5, %p412_p4 }
   0xe   :  { %p415_p7 = pnand %p414_p6, %p408_p3 }
  0x10   :  { %418 = shalt.err (!%p415_p7)
}
  0x11   :  { %s470_s19 = smov 128   ;;  %s471_s20 = smov 8  }
  0x12   :  { %21 = dma.hbm_to_vmem [thread:$0]  %s550_s0, 256, %s16_s10, [#allocation3], %s470_s19, %s470_s19, %s471_s20  }
  0x13   :  { %s472_s23 = smov [#allocation5]   ;;  %s419_s27 = scalar_lea.hbm %s551_s1, 512 }
  0x14   :  { %s27_s24 = sshll.u32 %s472_s23, 4  ;;  %p420_p8 = scmp.ne.s32.totalorder %s551_s1, %s419_s27  ;;  %s28_s24 = int_to_ptr.vmem [resolvable:$true] %s27_s24 }
  0x15   :  { %p423_p9 = scmp.lt.u32.totalorder %s419_s27, %s551_s1 }
  0x17   :  { %p425_p10 = pnand %p423_p9, %p420_p8 }
  0x19   :  { %428 = shalt.err (!%p425_p10)
}
  0x1a   :  { %s429_s4 = scalar_lea.vmem %s28_s24, 512  ;;  %p434_p12 = scmp.lt.s32.totalorder %s28_s24, %s28_s24 }
  0x1b   :  { %p430_p11 = scmp.ne.s32.totalorder %s28_s24, %s429_s4  ;;  %p435_p13 = scmp.lt.s32.totalorder %s429_s4, %s429_s4 }
  0x1d   :  { %p436_p0 = por %p435_p13, %p434_p12 }
  0x1f   :  { %p437_p1 = pnand %p436_p0, %p430_p11 }
  0x21   :  { %440 = shalt.err (!%p437_p1)
}
  0x22   :  { %33 = dma.hbm_to_vmem [thread:$0]  %s551_s1, 512, %s28_s24, [#allocation6], %s470_s19, %s470_s19, %s471_s20  }
  0x23   :  { %463 = dma.done.wait [#allocation3], 256  }
  0x24   :  { %464 = vsyncadd [#allocation3], 4294967040 }
  0x25   :  { %465 = dma.done.wait [#allocation6], 512  }
  0x26   :  { %466 = vsyncadd [#allocation6], 4294966784  ;;  %v473_v0 = vmov 0.0   ;;  %vm46_vm0 = vcmask 261120   ;;  %v42_v1 = vld [vmem:[#allocation5] sm:$0xff]  ;;  %v43_v2 = vld [vmem:[#allocation5 + $0x8] sm:$0xff] }
  0x27   :  { %360 = vmatprep.subr.mxu1 %v473_v0  ;;  %vm371_vm1 = vmpackc.low %vm46_vm0, %vm46_vm0  ;;  %v44_v3 = vld [vmem:[#allocation5 + $0x10] sm:$0xff]  ;;  %v370_v4 = vpack.c.bf16 %v43_v2, %v42_v1  ;;  %v45_v5 = vld [vmem:[#allocation5 + $0x18] sm:$0xff]  ;;  %vm474_vm2 = vmmov 0   ;;  %vm286_vm3 = vcmask 64512   ;;  %s475_s1 = smov [#allocation7]  }
  0x28   :  { %v40_v6 = vld [vmem:[#allocation2] sm:$0xff]  ;;  %v376_v7 = vpack.c.bf16 %v45_v5, %v44_v3  ;;  %v41_v8 = vld [vmem:[#allocation2 + $0x8] sm:$0xff]  ;;  %362 = vmatprep.mubr.msk.f32.mxu1 %vm474_vm2, %v473_v0  ;;  %s316_s6 = sshll.u32 %s475_s1, 4  ;;  %s317_s6 = int_to_ptr.vmem [resolvable:$true] %s316_s6 }
  0x29   :  { %357 = vmatprep.mubr.msk.f32.mxu0 %vm46_vm0, %v40_v6  ;;  %361 = vmatpush3.xpose.msk.msra.mxu1 %vm46_vm0, %v40_v6  ;;  %s441_s7 = scalar_lea.vmem %s317_s6, 256  ;;  %p446_p3 = scmp.lt.s32.totalorder %s317_s6, %s317_s6 }
  0x2a   :  { %372 = vmatprep.subr.msk.bf16.mxu0 %vm371_vm1, %v370_v4  ;;  %365 = vmatprep.subr.mxu1 %v473_v0  ;;  %p442_p2 = scmp.ne.s32.totalorder %s317_s6, %s441_s7  ;;  %p447_p4 = scmp.lt.s32.totalorder %s441_s7, %s441_s7 }
  0x2b   :  { %375 = vmatpush3.bf16.xpose.msk.msra.mxu0 %vm371_vm1, %v370_v4 }
  0x2c   :  { %378 = vmatprep.subr.msk.bf16.mxu0 %vm371_vm1, %v376_v7  ;;  %p448_p5 = por %p447_p4, %p446_p3 }
  0x2e   :  { %p449_p6 = pnand %p448_p5, %p442_p2 }
  0x33   :  { %381 = vmatpush3.bf16.xpose.msk.msra.mxu0 %vm371_vm1, %v376_v7 }
  0x3a   :  { %358 = vmatmul.mubr.msk.f32.vlgmr.msra.gmra.mrb[0].mxu0 %vm46_vm0, %v41_v8 }
 0x10d   :  { %v359_v9 = vpop.f32.mrb[0].mxu0 }
 0x10e   :  { %v131_v10 = vpop.f32.mrb[1].mxu0 }
 0x10f   :  { %363 = vmatmul.mubr.msk.f32.vlgmr.msra.gmra.mrb[0].mxu1 %vm46_vm0, %v131_v10 }
 0x110   :  { %366 = vmatpush3.xpose.msk.msra.mxu1 %vm46_vm0, %v41_v8  ;;  %367 = vmatprep.mubr.msk.f32.mxu1 %vm474_vm2, %v473_v0 }
 0x113   :  { %368 = vmatmul.mubr.msk.f32.vlgmr.msra.gmra.mrb[2].mxu1 %vm46_vm0, %v359_v9 }
 0x1e2   :  { %v209_v11 = vpop.f32.mrb[0].mxu1 }
 0x1e3   :  { %v364_v12 = vpop.f32.mrb[1].mxu1  ;;  %v287_v13 = vsel %vm286_vm3, %v209_v11, -inf }
 0x1e4   :  { %288 = vmax.xlane.f32.xlu0 %v287_v13 }
 0x1e6   :  { %v282_v14 = vpop.f32.mrb[2].mxu1 }
 0x1e7   :  { %v369_v15 = vpop.f32.mrb[3].mxu1  ;;  %v290_v16 = vsel %vm286_vm3, %v282_v14, -inf }
 0x1e8   :  { %291 = vmax.xlane.f32.xlu0 %v290_v16 }
 0x271   :  { %v289_v17 = vpop.xlane.xlu0 %288 }
 0x272   :  { %v293_v18 = vsub.f32 %v209_v11, %v289_v17 }
 0x274   :  { %v295_v19 = vmul.f32 1.442695, %v293_v18 }
 0x275   :  { %v292_v20 = vpop.xlane.xlu0 %291 }
 0x276   :  { %389 = vpow2.f32 %v295_v19  ;;  %v294_v21 = vsub.f32 %v282_v14, %v292_v20 }
 0x278   :  { %v297_v22 = vmul.f32 1.442695, %v294_v21 }
 0x27a   :  { %391 = vpow2.f32 %v297_v22 }
 0x280   :  { %v390_v23 = vpop.eup %389 }
 0x281   :  { %v299_v24 = vsel %vm286_vm3, %v390_v23, 0.0 }
 0x282   :  { %300 = vadd.xlane.f32.xlu1 %v299_v24 }
 0x284   :  { %v392_v25 = vpop.eup %391 }
 0x285   :  { %v302_v26 = vsel %vm286_vm3, %v392_v25, 0.0 }
 0x286   :  { %303 = vadd.xlane.f32.xlu1 %v302_v26 }
 0x30f   :  { %v301_v27 = vpop.xlane.xlu1 %300 }
 0x310   :  { %393 = vrcp.f32 %v301_v27 }
 0x313   :  { %v304_v28 = vpop.xlane.xlu1 %303 }
 0x314   :  { %395 = vrcp.f32 %v304_v28 }
 0x31a   :  { %v394_v29 = vpop.eup %393 }
 0x31b   :  { %v306_v30 = vmul.f32 %v394_v29, %v390_v23 }
 0x31d   :  { %309 = vst.msk [vmem:[#allocation7] sm:$0xff] %vm286_vm3, %v306_v30 }
 0x31e   :  { %v396_v31 = vpop.eup %395 }
 0x31f   :  { %v308_v32 = vmul.f32 %v396_v31, %v392_v25 }
 0x321   :  { %310 = vst.msk [vmem:[#allocation7 + $0x8] sm:$0xff] %vm286_vm3, %v308_v32 }
 0x322   :  { %452 = shalt.err (!%p449_p6)
}
 0x323   :  { %s453_s10 = scalar_lea.hbm %s552_s2, 256 }
 0x324   :  { %p454_p7 = scmp.ne.s32.totalorder %s552_s2, %s453_s10  ;;  %p457_p8 = scmp.lt.u32.totalorder %s453_s10, %s552_s2 }
 0x326   :  { %p459_p9 = pnand %p457_p8, %p454_p7 }
 0x328   :  { %462 = shalt.err (!%p459_p9)
}
 0x329   :  { %322 = dma.vmem_to_hbm [thread:$0]  %s317_s6, 256, %s552_s2, [#allocation4], %s470_s19, %s470_s19, %s471_s20  }
 0x32a   :  { %467 = dma.done.wait [#allocation4], 256  }
 0x32b   :  { %468 = vsyncadd [#allocation4], 4294967040 }
 0x32c   :  { %326 = vsyncpa [#allocation3], 1 }
 0x32d   :  { %327 = vsyncpa [#allocation6], 1 }
 0x32e   :  { %328 = vsyncpa [#allocation4], 1 }

</bundles_post_ra>
